<compile_context>
chip_gen: v7x
topology: tpu7x:2x2x1
jax: 0.10.0
libtpu: 0.0.40
codegen_flags: <defaults>
</compile_context>

<pallas_src>
import functools
import math

import jax
import jax.numpy as jnp
from jax import lax
from jax.experimental import pallas as pl
from jax.experimental.pallas import tpu as pltpu

_INV_SQRT2 = 1.0 / math.sqrt(2.0)


def _gelu_exact(x):
    # PyTorch nn.GELU() default is the exact erf-based formulation.
    return 0.5 * x * (1.0 + lax.erf(x * _INV_SQRT2))


def _encoder_kernel(x_ref, wih_ref, whh_ref, b_ref, wfc_ref, bfc_ref,
                    out_ref, gx_ref, h_ref, *, seq_len, batch):
    S, B = seq_len, batch
    H = whh_ref.shape[0]

    # ---- hoisted input projection: ONE matmul for all timesteps, parked in
    # a VMEM scratch so per-step reads are plain sublane loads --------------
    gx_ref[...] = (jnp.dot(x_ref[...], wih_ref[...],
                           preferred_element_type=jnp.float32)
                   + b_ref[...])                                # (S*B, 4H)

    whh = whh_ref[...]                                          # (H, 4H)

    # Hoisted affine masks implementing the single-tanh gate activation:
    #   g-block  (lanes [2H,3H)):  act = tanh(gates)
    #   i/f/o    (other lanes)  :  act = sigmoid(gates) = 0.5*(tanh(gates/2)+1)
    lane = lax.broadcasted_iota(jnp.int32, (B, 4 * H), 1)
    is_g = (lane >= 2 * H) & (lane < 3 * H)
    gate_scale = jnp.where(is_g, 1.0, 0.5).astype(jnp.float32)  # pre & post
    gate_off = jnp.where(is_g, 0.0, 0.5).astype(jnp.float32)

    h = jnp.zeros((B, H), jnp.float32)
    c = jnp.zeros((B, H), jnp.float32)
    # Fully unrolled recurrence (S static & tiny); only h @ W_hh^T, one tanh
    # pass and the elementwise gate math sit on the serial dependency chain.
    for t in range(S):
        gates = (gx_ref[t * B:(t + 1) * B, :]
                 + jnp.dot(h, whh, preferred_element_type=jnp.float32))
        tg = jnp.tanh(gates * gate_scale)                       # one EUP pass
        act = tg * gate_scale + gate_off
        i_g = act[:, 0:H]
        f_g = act[:, H:2 * H]
        g_g = act[:, 2 * H:3 * H]
        o_g = act[:, 3 * H:4 * H]
        c = f_g * c + i_g * g_g
        h = o_g * jnp.tanh(c)
        h_ref[t * B:(t + 1) * B, :] = h                         # cheap vst

    # ---- batched head over all timesteps: GELU -> FC -> GELU -> normalize --
    y = _gelu_exact(h_ref[...])                                 # (S*B, H)
    z = (jnp.dot(y, wfc_ref[...], preferred_element_type=jnp.float32)
         + bfc_ref[...])
    z = _gelu_exact(z)
    sumsq = jnp.sum(z * z, axis=-1, keepdims=True)
    # 1 / max(||z||, 1e-12)  ==  rsqrt(max(sum(z^2), 1e-24))
    inv_norm = lax.rsqrt(jnp.maximum(sumsq, 1e-24))
    out_ref[...] = z * inv_norm                                 # single store


def prepare_params(params):
    """One-time parameter prep (transposes / bias fusion) outside the hot path."""
    H4 = params["w_ih"].shape[0]
    O = params["w_fc"].shape[0]
    return {
        "wih_t": jnp.asarray(params["w_ih"]).T,                  # (D, 4H)
        "whh_t": jnp.asarray(params["w_hh"]).T,                  # (H, 4H)
        "b_lstm": (params["b_ih"] + params["b_hh"]).reshape(1, H4),
        "wfc_t": jnp.asarray(params["w_fc"]).T,                  # (H, O)
        "b_fc": jnp.asarray(params["b_fc"]).reshape(1, O),
    }


@jax.jit
def text_encoder3_forward(text_features, prep):
    """text_features: (S, B, D) float32 (seq-first, like nn.LSTM default)."""
    S, B, D = text_features.shape
    H = prep["whh_t"].shape[0]
    O = prep["wfc_t"].shape[1]

    # Flatten (S, B, D) -> (S*B, D) in the wrapper (free XLA reshape) so the
    # kernel works purely on 2D tiles and writes one output slab.
    x2d = text_features.reshape(S * B, D)

    kernel = functools.partial(_encoder_kernel, seq_len=S, batch=B)
    vmem = lambda: pl.BlockSpec(memory_space=pltpu.MemorySpace.VMEM)
    out2d = pl.pallas_call(
        kernel,
        out_shape=jax.ShapeDtypeStruct((S * B, O), jnp.float32),
        in_specs=[vmem() for _ in range(6)],
        out_specs=vmem(),
        scratch_shapes=[
            pltpu.VMEM((S * B, 4 * H), jnp.float32),   # gates_x scratch
            pltpu.VMEM((S * B, H), jnp.float32),       # per-step hidden states
        ],
    )(x2d, prep["wih_t"], prep["whh_t"], prep["b_lstm"],
      prep["wfc_t"], prep["b_fc"])

    return out2d.reshape(S, B, O)


# ---------------------------------------------------------------------------
# Pure-JAX reference (for a silent correctness check).
# ---------------------------------------------------------------------------
def _encoder_ref(x, p):
    S, B, D = x.shape
    H = p["w_hh"].shape[1]

    def step(carry, x_t):
        h, c = carry
        gates = x_t @ p["w_ih"].T + h @ p["w_hh"].T + p["b_ih"] + p["b_hh"]
        i, f, g, o = jnp.split(gates, 4, axis=-1)
        i, f, o = jax.nn.sigmoid(i), jax.nn.sigmoid(f), jax.nn.sigmoid(o)
        g = jnp.tanh(g)
        c = f * c + i * g
        h = o * jnp.tanh(c)
        return (h, c), h

    h0 = jnp.zeros((B, H), jnp.float32)
    _, hs = lax.scan(step, (h0, h0), x)
    y = _gelu_exact(hs)
    z = _gelu_exact(y @ p["w_fc"].T + p["b_fc"])
    norm = jnp.linalg.norm(z, axis=-1, keepdims=True)
    return z / jnp.maximum(norm, 1e-12)


def _init_encoder_params(key, input_size, hidden_size, output_size):
    ks = jax.random.split(key, 6)
    k = 1.0 / math.sqrt(hidden_size)
    u = lambda kk, shape: jax.random.uniform(kk, shape, jnp.float32, -k, k)
    return {
        "w_ih": u(ks[0], (4 * hidden_size, input_size)),
        "w_hh": u(ks[1], (4 * hidden_size, hidden_size)),
        "b_ih": u(ks[2], (4 * hidden_size,)),
        "b_hh": u(ks[3], (4 * hidden_size,)),
        "w_fc": u(ks[4], (output_size, hidden_size)),
        "b_fc": u(ks[5], (output_size,)),
    }


if __name__ == "__main__":
    SEQ, BATCH = 8, 2
    INPUT = HIDDEN = OUTPUT = 32

    key = jax.random.PRNGKey(0)
    k_params, k_x = jax.random.split(key, 2)

    params = _init_encoder_params(k_params, INPUT, HIDDEN, OUTPUT)
    text_features = jax.random.normal(k_x, (SEQ, BATCH, INPUT), jnp.float32)

    # One-time param prep (kept out of the per-call path).
    prep = jax.tree_util.tree_map(jax.block_until_ready, prepare_params(params))

    text_emb = text_encoder3_forward(text_features, prep)
    jax.block_until_ready(text_emb)

    # silent correctness check against the pure-JAX reference
    ref = _encoder_ref(text_features, params)
    assert text_emb.shape == (SEQ, BATCH, OUTPUT)
    assert jnp.allclose(text_emb, ref, atol=1e-5, rtol=1e-5)

    print("KERNEL_OK")
</pallas_src>

<mosaic_0001>
module attributes {stable_mosaic.version = 11 : i64} {
  func.func @_encoder_kernel(%arg0: memref<16x32xf32, #tpu.memory_space<vmem>>, %arg1: memref<32x128xf32, #tpu.memory_space<vmem>>, %arg2: memref<32x128xf32, #tpu.memory_space<vmem>>, %arg3: memref<1x128xf32, #tpu.memory_space<vmem>>, %arg4: memref<32x32xf32, #tpu.memory_space<vmem>>, %arg5: memref<1x32xf32, #tpu.memory_space<vmem>>, %arg6: memref<16x32xf32, #tpu.memory_space<vmem>>, %arg7: memref<16x128xf32, #tpu.memory_space<vmem>>, %arg8: memref<16x32xf32, #tpu.memory_space<vmem>>) attributes {dimension_semantics = [], scalar_prefetch = 0 : i64, scratch_operands = 2 : i64, tpu.core_type = #tpu.core_type<tc>} {
    %c0 = arith.constant 0 : index
    %c0_0 = arith.constant 0 : index
    %0 = vector.load %arg0[%c0, %c0_0] : memref<16x32xf32, #tpu.memory_space<vmem>>, vector<16x32xf32>
    %c0_1 = arith.constant 0 : index
    %c0_2 = arith.constant 0 : index
    %1 = vector.load %arg1[%c0_1, %c0_2] : memref<32x128xf32, #tpu.memory_space<vmem>>, vector<32x128xf32>
    %cst = arith.constant dense<0.000000e+00> : vector<16x128xf32>
    %2 = tpu.matmul %0, %1, %cst {dimension_numbers = #tpu.dot_dimension_numbers<[1], [0], [0], [1], [0, 0, 1, 1], [], []>} : vector<16x32xf32>, vector<32x128xf32>, vector<16x128xf32> -> vector<16x128xf32>
    %c0_3 = arith.constant 0 : index
    %c0_4 = arith.constant 0 : index
    %3 = vector.load %arg3[%c0_3, %c0_4] : memref<1x128xf32, #tpu.memory_space<vmem>>, vector<1x128xf32>
    %4 = vector.broadcast %3 : vector<1x128xf32> to vector<16x128xf32>
    %5 = arith.addf %2, %4 : vector<16x128xf32>
    %c0_5 = arith.constant 0 : index
    %c0_6 = arith.constant 0 : index
    %6 = vector.load %arg7[%c0_5, %c0_6] : memref<16x128xf32, #tpu.memory_space<vmem>>, vector<16x128xf32>
    tpu.vector_store %arg7[%c0_5, %c0_6], %5 {strides = array<i32>} : memref<16x128xf32, #tpu.memory_space<vmem>>, vector<16x128xf32>,
    %c0_7 = arith.constant 0 : index
    %c0_8 = arith.constant 0 : index
    %7 = vector.load %arg2[%c0_7, %c0_8] : memref<32x128xf32, #tpu.memory_space<vmem>>, vector<32x128xf32>
    %8 = tpu.iota {dimensions = array<i32: 1>} : vector<2x128xi32>
    %c64_i32 = arith.constant 64 : i32
    %9 = vector.broadcast %c64_i32 : i32 to vector<2x128xi32>
    %10 = arith.cmpi sge, %8, %9 : vector<2x128xi32>
    %c96_i32 = arith.constant 96 : i32
    %11 = vector.broadcast %c96_i32 : i32 to vector<2x128xi32>
    %12 = arith.cmpi slt, %8, %11 : vector<2x128xi32>
    %13 = arith.andi %10, %12 : vector<2x128xi1>
    %cst_9 = arith.constant 1.000000e+00 : f32
    %cst_10 = arith.constant 5.000000e-01 : f32
    %14 = vector.broadcast %cst_9 : f32 to vector<2x128xf32>
    %15 = vector.broadcast %cst_10 : f32 to vector<2x128xf32>
    %16 = arith.select %13, %14, %15 : vector<2x128xi1>, vector<2x128xf32>
    %cst_11 = arith.constant 0.000000e+00 : f32
    %cst_12 = arith.constant 5.000000e-01 : f32
    %17 = vector.broadcast %cst_11 : f32 to vector<2x128xf32>
    %18 = vector.broadcast %cst_12 : f32 to vector<2x128xf32>
    %19 = arith.select %13, %17, %18 : vector<2x128xi1>, vector<2x128xf32>
    %cst_13 = arith.constant 0.000000e+00 : f32
    %20 = vector.broadcast %cst_13 : f32 to vector<2x32xf32>
    %cst_14 = arith.constant 0.000000e+00 : f32
    %21 = vector.broadcast %cst_14 : f32 to vector<2x32xf32>
    %c0_15 = arith.constant 0 : index
    %c0_16 = arith.constant 0 : index
    %22 = vector.load %arg7[%c0_15, %c0_16] : memref<16x128xf32, #tpu.memory_space<vmem>>, vector<2x128xf32>
    %cst_17 = arith.constant dense<0.000000e+00> : vector<2x128xf32>
    %23 = tpu.matmul %20, %7, %cst_17 {dimension_numbers = #tpu.dot_dimension_numbers<[1], [0], [0], [1], [0, 0, 1, 1], [], []>} : vector<2x32xf32>, vector<32x128xf32>, vector<2x128xf32> -> vector<2x128xf32>
    %24 = arith.addf %22, %23 : vector<2x128xf32>
    %25 = arith.mulf %24, %16 : vector<2x128xf32>
    %26 = math.tanh %25 : vector<2x128xf32>
    %27 = arith.mulf %26, %16 : vector<2x128xf32>
    %28 = arith.addf %27, %19 : vector<2x128xf32>
    %29 = vector.extract_strided_slice %28 {offsets = [0, 0], sizes = [2, 32], strides = [1, 1]} : vector<2x128xf32> to vector<2x32xf32>
    %30 = vector.extract_strided_slice %28 {offsets = [0, 32], sizes = [2, 32], strides = [1, 1]} : vector<2x128xf32> to vector<2x32xf32>
    %31 = vector.extract_strided_slice %28 {offsets = [0, 64], sizes = [2, 32], strides = [1, 1]} : vector<2x128xf32> to vector<2x32xf32>
    %32 = vector.extract_strided_slice %28 {offsets = [0, 96], sizes = [2, 32], strides = [1, 1]} : vector<2x128xf32> to vector<2x32xf32>
    %33 = arith.mulf %30, %21 : vector<2x32xf32>
    %34 = arith.mulf %29, %31 : vector<2x32xf32>
    %35 = arith.addf %33, %34 : vector<2x32xf32>
    %36 = math.tanh %35 : vector<2x32xf32>
    %37 = arith.mulf %32, %36 : vector<2x32xf32>
    %c0_18 = arith.constant 0 : index
    %c0_19 = arith.constant 0 : index
    %38 = vector.load %arg8[%c0_18, %c0_19] : memref<16x32xf32, #tpu.memory_space<vmem>>, vector<2x32xf32>
    tpu.vector_store %arg8[%c0_18, %c0_19], %37 {strides = array<i32>} : memref<16x32xf32, #tpu.memory_space<vmem>>, vector<2x32xf32>,
    %c2 = arith.constant 2 : index
    %c0_20 = arith.constant 0 : index
    %39 = vector.load %arg7[%c2, %c0_20] : memref<16x128xf32, #tpu.memory_space<vmem>>, vector<2x128xf32>
    %cst_21 = arith.constant dense<0.000000e+00> : vector<2x128xf32>
    %40 = tpu.matmul %37, %7, %cst_21 {dimension_numbers = #tpu.dot_dimension_numbers<[1], [0], [0], [1], [0, 0, 1, 1], [], []>} : vector<2x32xf32>, vector<32x128xf32>, vector<2x128xf32> -> vector<2x128xf32>
    %41 = arith.addf %39, %40 : vector<2x128xf32>
    %42 = arith.mulf %41, %16 : vector<2x128xf32>
    %43 = math.tanh %42 : vector<2x128xf32>
    %44 = arith.mulf %43, %16 : vector<2x128xf32>
    %45 = arith.addf %44, %19 : vector<2x128xf32>
    %46 = vector.extract_strided_slice %45 {offsets = [0, 0], sizes = [2, 32], strides = [1, 1]} : vector<2x128xf32> to vector<2x32xf32>
    %47 = vector.extract_strided_slice %45 {offsets = [0, 32], sizes = [2, 32], strides = [1, 1]} : vector<2x128xf32> to vector<2x32xf32>
    %48 = vector.extract_strided_slice %45 {offsets = [0, 64], sizes = [2, 32], strides = [1, 1]} : vector<2x128xf32> to vector<2x32xf32>
    %49 = vector.extract_strided_slice %45 {offsets = [0, 96], sizes = [2, 32], strides = [1, 1]} : vector<2x128xf32> to vector<2x32xf32>
    %50 = arith.mulf %47, %35 : vector<2x32xf32>
    %51 = arith.mulf %46, %48 : vector<2x32xf32>
    %52 = arith.addf %50, %51 : vector<2x32xf32>
    %53 = math.tanh %52 : vector<2x32xf32>
    %54 = arith.mulf %49, %53 : vector<2x32xf32>
    %c2_22 = arith.constant 2 : index
    %c0_23 = arith.constant 0 : index
    %55 = vector.load %arg8[%c2_22, %c0_23] : memref<16x32xf32, #tpu.memory_space<vmem>>, vector<2x32xf32>
    tpu.vector_store %arg8[%c2_22, %c0_23], %54 {strides = array<i32>} : memref<16x32xf32, #tpu.memory_space<vmem>>, vector<2x32xf32>,
    %c4 = arith.constant 4 : index
    %c0_24 = arith.constant 0 : index
    %56 = vector.load %arg7[%c4, %c0_24] : memref<16x128xf32, #tpu.memory_space<vmem>>, vector<2x128xf32>
    %cst_25 = arith.constant dense<0.000000e+00> : vector<2x128xf32>
    %57 = tpu.matmul %54, %7, %cst_25 {dimension_numbers = #tpu.dot_dimension_numbers<[1], [0], [0], [1], [0, 0, 1, 1], [], []>} : vector<2x32xf32>, vector<32x128xf32>, vector<2x128xf32> -> vector<2x128xf32>
    %58 = arith.addf %56, %57 : vector<2x128xf32>
    %59 = arith.mulf %58, %16 : vector<2x128xf32>
    %60 = math.tanh %59 : vector<2x128xf32>
    %61 = arith.mulf %60, %16 : vector<2x128xf32>
    %62 = arith.addf %61, %19 : vector<2x128xf32>
    %63 = vector.extract_strided_slice %62 {offsets = [0, 0], sizes = [2, 32], strides = [1, 1]} : vector<2x128xf32> to vector<2x32xf32>
    %64 = vector.extract_strided_slice %62 {offsets = [0, 32], sizes = [2, 32], strides = [1, 1]} : vector<2x128xf32> to vector<2x32xf32>
    %65 = vector.extract_strided_slice %62 {offsets = [0, 64], sizes = [2, 32], strides = [1, 1]} : vector<2x128xf32> to vector<2x32xf32>
    %66 = vector.extract_strided_slice %62 {offsets = [0, 96], sizes = [2, 32], strides = [1, 1]} : vector<2x128xf32> to vector<2x32xf32>
    %67 = arith.mulf %64, %52 : vector<2x32xf32>
    %68 = arith.mulf %63, %65 : vector<2x32xf32>
    %69 = arith.addf %67, %68 : vector<2x32xf32>
    %70 = math.tanh %69 : vector<2x32xf32>
    %71 = arith.mulf %66, %70 : vector<2x32xf32>
    %c4_26 = arith.constant 4 : index
    %c0_27 = arith.constant 0 : index
    %72 = vector.load %arg8[%c4_26, %c0_27] : memref<16x32xf32, #tpu.memory_space<vmem>>, vector<2x32xf32>
    tpu.vector_store %arg8[%c4_26, %c0_27], %71 {strides = array<i32>} : memref<16x32xf32, #tpu.memory_space<vmem>>, vector<2x32xf32>,
    %c6 = arith.constant 6 : index
    %c0_28 = arith.constant 0 : index
    %73 = vector.load %arg7[%c6, %c0_28] : memref<16x128xf32, #tpu.memory_space<vmem>>, vector<2x128xf32>
    %cst_29 = arith.constant dense<0.000000e+00> : vector<2x128xf32>
    %74 = tpu.matmul %71, %7, %cst_29 {dimension_numbers = #tpu.dot_dimension_numbers<[1], [0], [0], [1], [0, 0, 1, 1], [], []>} : vector<2x32xf32>, vector<32x128xf32>, vector<2x128xf32> -> vector<2x128xf32>
    %75 = arith.addf %73, %74 : vector<2x128xf32>
    %76 = arith.mulf %75, %16 : vector<2x128xf32>
    %77 = math.tanh %76 : vector<2x128xf32>
    %78 = arith.mulf %77, %16 : vector<2x128xf32>
    %79 = arith.addf %78, %19 : vector<2x128xf32>
    %80 = vector.extract_strided_slice %79 {offsets = [0, 0], sizes = [2, 32], strides = [1, 1]} : vector<2x128xf32> to vector<2x32xf32>
    %81 = vector.extract_strided_slice %79 {offsets = [0, 32], sizes = [2, 32], strides = [1, 1]} : vector<2x128xf32> to vector<2x32xf32>
    %82 = vector.extract_strided_slice %79 {offsets = [0, 64], sizes = [2, 32], strides = [1, 1]} : vector<2x128xf32> to vector<2x32xf32>
    %83 = vector.extract_strided_slice %79 {offsets = [0, 96], sizes = [2, 32], strides = [1, 1]} : vector<2x128xf32> to vector<2x32xf32>
    %84 = arith.mulf %81, %69 : vector<2x32xf32>
    %85 = arith.mulf %80, %82 : vector<2x32xf32>
    %86 = arith.addf %84, %85 : vector<2x32xf32>
    %87 = math.tanh %86 : vector<2x32xf32>
    %88 = arith.mulf %83, %87 : vector<2x32xf32>
    %c6_30 = arith.constant 6 : index
    %c0_31 = arith.constant 0 : index
    %89 = vector.load %arg8[%c6_30, %c0_31] : memref<16x32xf32, #tpu.memory_space<vmem>>, vector<2x32xf32>
    tpu.vector_store %arg8[%c6_30, %c0_31], %88 {strides = array<i32>} : memref<16x32xf32, #tpu.memory_space<vmem>>, vector<2x32xf32>,
    %c8 = arith.constant 8 : index
    %c0_32 = arith.constant 0 : index
    %90 = vector.load %arg7[%c8, %c0_32] : memref<16x128xf32, #tpu.memory_space<vmem>>, vector<2x128xf32>
    %cst_33 = arith.constant dense<0.000000e+00> : vector<2x128xf32>
    %91 = tpu.matmul %88, %7, %cst_33 {dimension_numbers = #tpu.dot_dimension_numbers<[1], [0], [0], [1], [0, 0, 1, 1], [], []>} : vector<2x32xf32>, vector<32x128xf32>, vector<2x128xf32> -> vector<2x128xf32>
    %92 = arith.addf %90, %91 : vector<2x128xf32>
    %93 = arith.mulf %92, %16 : vector<2x128xf32>
    %94 = math.tanh %93 : vector<2x128xf32>
    %95 = arith.mulf %94, %16 : vector<2x128xf32>
    %96 = arith.addf %95, %19 : vector<2x128xf32>
    %97 = vector.extract_strided_slice %96 {offsets = [0, 0], sizes = [2, 32], strides = [1, 1]} : vector<2x128xf32> to vector<2x32xf32>
    %98 = vector.extract_strided_slice %96 {offsets = [0, 32], sizes = [2, 32], strides = [1, 1]} : vector<2x128xf32> to vector<2x32xf32>
    %99 = vector.extract_strided_slice %96 {offsets = [0, 64], sizes = [2, 32], strides = [1, 1]} : vector<2x128xf32> to vector<2x32xf32>
    %100 = vector.extract_strided_slice %96 {offsets = [0, 96], sizes = [2, 32], strides = [1, 1]} : vector<2x128xf32> to vector<2x32xf32>
    %101 = arith.mulf %98, %86 : vector<2x32xf32>
    %102 = arith.mulf %97, %99 : vector<2x32xf32>
    %103 = arith.addf %101, %102 : vector<2x32xf32>
    %104 = math.tanh %103 : vector<2x32xf32>
    %105 = arith.mulf %100, %104 : vector<2x32xf32>
    %c8_34 = arith.constant 8 : index
    %c0_35 = arith.constant 0 : index
    %106 = vector.load %arg8[%c8_34, %c0_35] : memref<16x32xf32, #tpu.memory_space<vmem>>, vector<2x32xf32>
    tpu.vector_store %arg8[%c8_34, %c0_35], %105 {strides = array<i32>} : memref<16x32xf32, #tpu.memory_space<vmem>>, vector<2x32xf32>,
    %c10 = arith.constant 10 : index
    %c0_36 = arith.constant 0 : index
    %107 = vector.load %arg7[%c10, %c0_36] : memref<16x128xf32, #tpu.memory_space<vmem>>, vector<2x128xf32>
    %cst_37 = arith.constant dense<0.000000e+00> : vector<2x128xf32>
    %108 = tpu.matmul %105, %7, %cst_37 {dimension_numbers = #tpu.dot_dimension_numbers<[1], [0], [0], [1], [0, 0, 1, 1], [], []>} : vector<2x32xf32>, vector<32x128xf32>, vector<2x128xf32> -> vector<2x128xf32>
    %109 = arith.addf %107, %108 : vector<2x128xf32>
    %110 = arith.mulf %109, %16 : vector<2x128xf32>
    %111 = math.tanh %110 : vector<2x128xf32>
    %112 = arith.mulf %111, %16 : vector<2x128xf32>
    %113 = arith.addf %112, %19 : vector<2x128xf32>
    %114 = vector.extract_strided_slice %113 {offsets = [0, 0], sizes = [2, 32], strides = [1, 1]} : vector<2x128xf32> to vector<2x32xf32>
    %115 = vector.extract_strided_slice %113 {offsets = [0, 32], sizes = [2, 32], strides = [1, 1]} : vector<2x128xf32> to vector<2x32xf32>
    %116 = vector.extract_strided_slice %113 {offsets = [0, 64], sizes = [2, 32], strides = [1, 1]} : vector<2x128xf32> to vector<2x32xf32>
    %117 = vector.extract_strided_slice %113 {offsets = [0, 96], sizes = [2, 32], strides = [1, 1]} : vector<2x128xf32> to vector<2x32xf32>
    %118 = arith.mulf %115, %103 : vector<2x32xf32>
    %119 = arith.mulf %114, %116 : vector<2x32xf32>
    %120 = arith.addf %118, %119 : vector<2x32xf32>
    %121 = math.tanh %120 : vector<2x32xf32>
    %122 = arith.mulf %117, %121 : vector<2x32xf32>
    %c10_38 = arith.constant 10 : index
    %c0_39 = arith.constant 0 : index
    %123 = vector.load %arg8[%c10_38, %c0_39] : memref<16x32xf32, #tpu.memory_space<vmem>>, vector<2x32xf32>
    tpu.vector_store %arg8[%c10_38, %c0_39], %122 {strides = array<i32>} : memref<16x32xf32, #tpu.memory_space<vmem>>, vector<2x32xf32>,
    %c12 = arith.constant 12 : index
    %c0_40 = arith.constant 0 : index
    %124 = vector.load %arg7[%c12, %c0_40] : memref<16x128xf32, #tpu.memory_space<vmem>>, vector<2x128xf32>
    %cst_41 = arith.constant dense<0.000000e+00> : vector<2x128xf32>
    %125 = tpu.matmul %122, %7, %cst_41 {dimension_numbers = #tpu.dot_dimension_numbers<[1], [0], [0], [1], [0, 0, 1, 1], [], []>} : vector<2x32xf32>, vector<32x128xf32>, vector<2x128xf32> -> vector<2x128xf32>
    %126 = arith.addf %124, %125 : vector<2x128xf32>
    %127 = arith.mulf %126, %16 : vector<2x128xf32>
    %128 = math.tanh %127 : vector<2x128xf32>
    %129 = arith.mulf %128, %16 : vector<2x128xf32>
    %130 = arith.addf %129, %19 : vector<2x128xf32>
    %131 = vector.extract_strided_slice %130 {offsets = [0, 0], sizes = [2, 32], strides = [1, 1]} : vector<2x128xf32> to vector<2x32xf32>
    %132 = vector.extract_strided_slice %130 {offsets = [0, 32], sizes = [2, 32], strides = [1, 1]} : vector<2x128xf32> to vector<2x32xf32>
    %133 = vector.extract_strided_slice %130 {offsets = [0, 64], sizes = [2, 32], strides = [1, 1]} : vector<2x128xf32> to vector<2x32xf32>
    %134 = vector.extract_strided_slice %130 {offsets = [0, 96], sizes = [2, 32], strides = [1, 1]} : vector<2x128xf32> to vector<2x32xf32>
    %135 = arith.mulf %132, %120 : vector<2x32xf32>
    %136 = arith.mulf %131, %133 : vector<2x32xf32>
    %137 = arith.addf %135, %136 : vector<2x32xf32>
    %138 = math.tanh %137 : vector<2x32xf32>
    %139 = arith.mulf %134, %138 : vector<2x32xf32>
    %c12_42 = arith.constant 12 : index
    %c0_43 = arith.constant 0 : index
    %140 = vector.load %arg8[%c12_42, %c0_43] : memref<16x32xf32, #tpu.memory_space<vmem>>, vector<2x32xf32>
    tpu.vector_store %arg8[%c12_42, %c0_43], %139 {strides = array<i32>} : memref<16x32xf32, #tpu.memory_space<vmem>>, vector<2x32xf32>,
    %c14 = arith.constant 14 : index
    %c0_44 = arith.constant 0 : index
    %141 = vector.load %arg7[%c14, %c0_44] : memref<16x128xf32, #tpu.memory_space<vmem>>, vector<2x128xf32>
    %cst_45 = arith.constant dense<0.000000e+00> : vector<2x128xf32>
    %142 = tpu.matmul %139, %7, %cst_45 {dimension_numbers = #tpu.dot_dimension_numbers<[1], [0], [0], [1], [0, 0, 1, 1], [], []>} : vector<2x32xf32>, vector<32x128xf32>, vector<2x128xf32> -> vector<2x128xf32>
    %143 = arith.addf %141, %142 : vector<2x128xf32>
    %144 = arith.mulf %143, %16 : vector<2x128xf32>
    %145 = math.tanh %144 : vector<2x128xf32>
    %146 = arith.mulf %145, %16 : vector<2x128xf32>
    %147 = arith.addf %146, %19 : vector<2x128xf32>
    %148 = vector.extract_strided_slice %147 {offsets = [0, 0], sizes = [2, 32], strides = [1, 1]} : vector<2x128xf32> to vector<2x32xf32>
    %149 = vector.extract_strided_slice %147 {offsets = [0, 32], sizes = [2, 32], strides = [1, 1]} : vector<2x128xf32> to vector<2x32xf32>
    %150 = vector.extract_strided_slice %147 {offsets = [0, 64], sizes = [2, 32], strides = [1, 1]} : vector<2x128xf32> to vector<2x32xf32>
    %151 = vector.extract_strided_slice %147 {offsets = [0, 96], sizes = [2, 32], strides = [1, 1]} : vector<2x128xf32> to vector<2x32xf32>
    %152 = arith.mulf %149, %137 : vector<2x32xf32>
    %153 = arith.mulf %148, %150 : vector<2x32xf32>
    %154 = arith.addf %152, %153 : vector<2x32xf32>
    %155 = math.tanh %154 : vector<2x32xf32>
    %156 = arith.mulf %151, %155 : vector<2x32xf32>
    %c14_46 = arith.constant 14 : index
    %c0_47 = arith.constant 0 : index
    %157 = vector.load %arg8[%c14_46, %c0_47] : memref<16x32xf32, #tpu.memory_space<vmem>>, vector<2x32xf32>
    tpu.vector_store %arg8[%c14_46, %c0_47], %156 {strides = array<i32>} : memref<16x32xf32, #tpu.memory_space<vmem>>, vector<2x32xf32>,
    %c0_48 = arith.constant 0 : index
    %c0_49 = arith.constant 0 : index
    %158 = vector.load %arg8[%c0_48, %c0_49] : memref<16x32xf32, #tpu.memory_space<vmem>>, vector<16x32xf32>
    %cst_50 = arith.constant 5.000000e-01 : f32
    %159 = vector.broadcast %cst_50 : f32 to vector<16x32xf32>
    %160 = arith.mulf %159, %158 : vector<16x32xf32>
    %cst_51 = arith.constant 0.707106769 : f32
    %161 = vector.broadcast %cst_51 : f32 to vector<16x32xf32>
    %162 = arith.mulf %158, %161 : vector<16x32xf32>
    %163 = math.erf %162 : vector<16x32xf32>
    %cst_52 = arith.constant 1.000000e+00 : f32
    %164 = vector.broadcast %cst_52 : f32 to vector<16x32xf32>
    %165 = arith.addf %164, %163 : vector<16x32xf32>
    %166 = arith.mulf %160, %165 : vector<16x32xf32>
    %c0_53 = arith.constant 0 : index
    %c0_54 = arith.constant 0 : index
    %167 = vector.load %arg4[%c0_53, %c0_54] : memref<32x32xf32, #tpu.memory_space<vmem>>, vector<32x32xf32>
    %cst_55 = arith.constant dense<0.000000e+00> : vector<16x32xf32>
    %168 = tpu.matmul %166, %167, %cst_55 {dimension_numbers = #tpu.dot_dimension_numbers<[1], [0], [0], [1], [0, 0, 1, 1], [], []>} : vector<16x32xf32>, vector<32x32xf32>, vector<16x32xf32> -> vector<16x32xf32>
    %c0_56 = arith.constant 0 : index
    %c0_57 = arith.constant 0 : index
    %169 = vector.load %arg5[%c0_56, %c0_57] : memref<1x32xf32, #tpu.memory_space<vmem>>, vector<1x32xf32>
    %170 = vector.broadcast %169 : vector<1x32xf32> to vector<16x32xf32>
    %171 = arith.addf %168, %170 : vector<16x32xf32>
    %cst_58 = arith.constant 5.000000e-01 : f32
    %172 = vector.broadcast %cst_58 : f32 to vector<16x32xf32>
    %173 = arith.mulf %172, %171 : vector<16x32xf32>
    %cst_59 = arith.constant 0.707106769 : f32
    %174 = vector.broadcast %cst_59 : f32 to vector<16x32xf32>
    %175 = arith.mulf %171, %174 : vector<16x32xf32>
    %176 = math.erf %175 : vector<16x32xf32>
    %cst_60 = arith.constant 1.000000e+00 : f32
    %177 = vector.broadcast %cst_60 : f32 to vector<16x32xf32>
    %178 = arith.addf %177, %176 : vector<16x32xf32>
    %179 = arith.mulf %173, %178 : vector<16x32xf32>
    %180 = arith.mulf %179, %179 : vector<16x32xf32>
    %cst_61 = arith.constant dense<0.000000e+00> : vector<16xf32>
    %181 = vector.multi_reduction <add>, %180, %cst_61 [1] : vector<16x32xf32> to vector<16xf32>
    %182 = vector.shape_cast %181 : vector<16xf32> to vector<16x1xf32>
    %cst_62 = arith.constant 1.000000e-24 : f32
    %183 = vector.broadcast %cst_62 : f32 to vector<16x1xf32>
    %184 = arith.maximumf %182, %183 : vector<16x1xf32>
    %185 = math.rsqrt %184 : vector<16x1xf32>
    %186 = vector.broadcast %185 : vector<16x1xf32> to vector<16x32xf32>
    %187 = arith.mulf %179, %186 : vector<16x32xf32>
    %c0_63 = arith.constant 0 : index
    %c0_64 = arith.constant 0 : index
    %188 = vector.load %arg6[%c0_63, %c0_64] : memref<16x32xf32, #tpu.memory_space<vmem>>, vector<16x32xf32>
    tpu.vector_store %arg6[%c0_63, %c0_64], %187 {strides = array<i32>} : memref<16x32xf32, #tpu.memory_space<vmem>>, vector<16x32xf32>,
    return
  }
}

</mosaic_0001>

<bundles_post_ra>
// kernel: text_encoder3_forward.1
= control target key start
LH: loop header
LB: loop body
LE: loop exit
PB: predicated region body
PF: predicated region fallthrough
CT: control target
= control target key end

     0   :  { %11 = vsyncpa [#allocation5], 0  ;;  %s1831_s0 = inlined_call_operand.hbm [shape: f32[16,32], index: 0, kind: input, shape index: {}]   ;;  %s1832_s1 = inlined_call_operand.hbm [shape: f32[32,128], index: 1, kind: input, shape index: {}]   ;;  %s1833_s2 = inlined_call_operand.hbm [shape: f32[32,128], index: 2, kind: input, shape index: {}]   ;;  %s1834_s3 = inlined_call_operand.vmem [shape: f32[1,128], index: 3, kind: input, shape index: {}]   ;;  %s1835_s4 = inlined_call_operand.hbm [shape: f32[32,32], index: 4, kind: input, shape index: {}]   ;;  %s1836_s5 = inlined_call_operand.vmem [shape: f32[1,32], index: 5, kind: input, shape index: {}]   ;;  %s1837_s6 = inlined_call_operand.hbm [shape: f32[16,32], index: 6, kind: output, shape index: {}]  }
   0x1   :  { %12 = vsyncpa [#allocation8], 0 }
   0x2   :  { %13 = vsyncpa [#allocation11], 0 }
   0x3   :  { %14 = vsyncpa [#allocation6], 0  ;;  %s1552_s21 = smov [#allocation7]   ;;  %s1553_s23 = smov [#allocation4]  }
   0x4   :  { %s32_s22 = sshll.u32 %s1552_s21, 4  ;;  %s20_s24 = sshll.u32 %s1553_s23, 4  ;;  %s33_s22 = int_to_ptr.vmem [resolvable:$true] %s32_s22  ;;  %s1600_s24 = int_to_ptr.vmem [resolvable:$true] %s20_s24 }
   0x5   :  { %s1434_s27 = scalar_lea.hbm %s1832_s1, 512 }
   0x6   :  { %p1435_p0 = scmp.ne.s32.totalorder %s1832_s1, %s1434_s27  ;;  %p1438_p1 = scmp.lt.u32.totalorder %s1434_s27, %s1832_s1 }
   0x8   :  { %p1440_p2 = pnand %p1438_p1, %p1435_p0 }
   0xa   :  { %1443 = shalt.err (!%p1440_p2)
}
   0xb   :  { %s1444_s8 = scalar_lea.vmem %s33_s22, 512  ;;  %p1449_p4 = scmp.lt.s32.totalorder %s33_s22, %s33_s22 }
   0xc   :  { %p1445_p3 = scmp.ne.s32.totalorder %s33_s22, %s1444_s8  ;;  %p1450_p5 = scmp.lt.s32.totalorder %s1444_s8, %s1444_s8 }
   0xe   :  { %p1451_p6 = por %p1450_p5, %p1449_p4 }
  0x10   :  { %p1452_p7 = pnand %p1451_p6, %p1445_p3 }
  0x12   :  { %1455 = shalt.err (!%p1452_p7)
}
  0x13   :  { %s1554_s9 = smov 128   ;;  %s1555_s10 = smov 8  }
  0x14   :  { %38 = dma.hbm_to_vmem [thread:$0]  %s1832_s1, 512, %s33_s22, [#allocation8], %s1554_s9, %s1554_s9, %s1555_s10  }
  0x15   :  { %s1456_s15 = scalar_lea.hbm %s1831_s0, 256 }
  0x16   :  { %p1457_p8 = scmp.ne.s32.totalorder %s1831_s0, %s1456_s15  ;;  %p1460_p9 = scmp.lt.u32.totalorder %s1456_s15, %s1831_s0 }
  0x18   :  { %p1462_p10 = pnand %p1460_p9, %p1457_p8 }
  0x1a   :  { %1465 = shalt.err (!%p1462_p10)
}
  0x1b   :  { %s1466_s20 = scalar_lea.vmem %s1600_s24, 256  ;;  %p1471_p12 = scmp.lt.s32.totalorder %s1600_s24, %s1600_s24 }
  0x1c   :  { %p1467_p11 = scmp.ne.s32.totalorder %s1600_s24, %s1466_s20  ;;  %p1472_p13 = scmp.lt.s32.totalorder %s1466_s20, %s1466_s20 }
  0x1e   :  { %p1473_p0 = por %p1472_p13, %p1471_p12 }
  0x20   :  { %p1474_p1 = pnand %p1473_p0, %p1467_p11 }
  0x22   :  { %1477 = shalt.err (!%p1474_p1)
}
  0x23   :  { %26 = dma.hbm_to_vmem [thread:$0]  %s1831_s0, 256, %s1600_s24, [#allocation5], %s1554_s9, %s1554_s9, %s1555_s10  }
  0x24   :  { %s1556_s22 = smov [#allocation9]   ;;  %s1557_s25 = smov [#allocation10]  }
  0x25   :  { %s44_s23 = sshll.u32 %s1556_s22, 4  ;;  %s58_s26 = sshll.u32 %s1557_s25, 4  ;;  %s45_s23 = int_to_ptr.vmem [resolvable:$true] %s44_s23  ;;  %s1637_s26 = int_to_ptr.vmem [resolvable:$true] %s58_s26 }
  0x26   :  { %s1478_s29 = scalar_lea.hbm %s1833_s2, 512 }
  0x27   :  { %p1479_p2 = scmp.ne.s32.totalorder %s1833_s2, %s1478_s29  ;;  %p1482_p3 = scmp.lt.u32.totalorder %s1478_s29, %s1833_s2 }
  0x29   :  { %p1484_p4 = pnand %p1482_p3, %p1479_p2 }
  0x2b   :  { %1487 = shalt.err (!%p1484_p4)
}
  0x2c   :  { %s1488_s0 = scalar_lea.vmem %s45_s23, 512  ;;  %p1493_p6 = scmp.lt.s32.totalorder %s45_s23, %s45_s23 }
  0x2d   :  { %p1489_p5 = scmp.ne.s32.totalorder %s45_s23, %s1488_s0  ;;  %p1494_p7 = scmp.lt.s32.totalorder %s1488_s0, %s1488_s0 }
  0x2f   :  { %p1495_p8 = por %p1494_p7, %p1493_p6 }
  0x31   :  { %p1496_p9 = pnand %p1495_p8, %p1489_p5 }
  0x33   :  { %1499 = shalt.err (!%p1496_p9)
}
  0x34   :  { %50 = dma.hbm_to_vmem [thread:$0]  %s1833_s2, 512, %s45_s23, [#allocation8], %s1554_s9, %s1554_s9, %s1555_s10  }
  0x35   :  { %s1500_s15 = scalar_lea.hbm %s1835_s4, 512 }
  0x36   :  { %p1501_p10 = scmp.ne.s32.totalorder %s1835_s4, %s1500_s15  ;;  %p1504_p11 = scmp.lt.u32.totalorder %s1500_s15, %s1835_s4 }
  0x38   :  { %p1506_p12 = pnand %p1504_p11, %p1501_p10 }
  0x3a   :  { %1509 = shalt.err (!%p1506_p12)
}
  0x3b   :  { %s1510_s20 = scalar_lea.vmem %s1637_s26, 512  ;;  %p1515_p0 = scmp.lt.s32.totalorder %s1637_s26, %s1637_s26 }
  0x3c   :  { %p1511_p13 = scmp.ne.s32.totalorder %s1637_s26, %s1510_s20  ;;  %p1516_p1 = scmp.lt.s32.totalorder %s1510_s20, %s1510_s20 }
  0x3e   :  { %p1517_p2 = por %p1516_p1, %p1515_p0 }
  0x40   :  { %p1518_p3 = pnand %p1517_p2, %p1511_p13 }
  0x42   :  { %1521 = shalt.err (!%p1518_p3)
}
  0x43   :  { %64 = dma.hbm_to_vmem [thread:$0]  %s1835_s4, 512, %s1637_s26, [#allocation11], %s1554_s9, %s1554_s9, %s1555_s10  }
  0x44   :  { %1544 = dma.done.wait [#allocation5], 256  }
  0x45   :  { %1545 = vsyncadd [#allocation5], 4294967040 }
  0x46   :  { %1546 = dma.done.wait [#allocation8], 1024  }
  0x47   :  { %1547 = vsyncadd [#allocation8], 4294966272 }
  0x48   :  { %1548 = dma.done.wait [#allocation11], 512  }
  0x49   :  { %1549 = vsyncadd [#allocation11], 4294966784  ;;  %v1558_v0 = vmov 0.0|0.0   ;;  %vm1559_vm0 = vmmov 0   ;;  %v1560_v1 = vmov 0.0   ;;  %vm92_vm1 = vcmask 261120  }
  0x4a   :  { %1321 = vmatprep.subr.bf16.mxu1 %v1558_v0  ;;  %1222 = vmatprep.mubr.msk.f32.mxu1 %vm1559_vm0, %v1560_v1  ;;  %v81_v2 = vld [vmem:[#allocation7] sm:$0xff]  ;;  %v82_v3 = vld [vmem:[#allocation7 + $0x8] sm:$0xff]  ;;  %v83_v4 = vld [vmem:[#allocation7 + $0x10] sm:$0xff]  ;;  %v180_v16 = vlaneseq  ;;  %v1561_v25 = vmov 0.5   ;;  %s1563_s22 = smov 32   ;;  %vm287_vm5 = vcmask 254976  }
  0x4b   :  { %v1313_v5 = vpack.c.bf16 %v82_v3, %v81_v2  ;;  %v84_v6 = vld [vmem:[#allocation7 + $0x18] sm:$0xff]  ;;  %v79_v7 = vld [vmem:[#allocation4] sm:$0xff]  ;;  %v176_v9 = vld [vmem:[#allocation9] sm:$0xff] }
  0x4c   :  { %v1317_v8 = vpack.c.bf16 %v84_v6, %v83_v4  ;;  %1211 = vmatprep.mubr.msk.f32.mxu0 %vm92_vm1, %v79_v7  ;;  %v177_v10 = vld [vmem:[#allocation9 + $0x8] sm:$0xff]  ;;  %v178_v11 = vld [vmem:[#allocation9 + $0x10] sm:$0xff]  ;;  %v179_v13 = vld [vmem:[#allocation9 + $0x18] sm:$0xff]  ;;  %v181_v21 = vand.u32 127, %v180_v16 }
  0x4d   :  { %1314 = vmatprep.subr.bf16.mxu0 %v1313_v5  ;;  %v1678_v12 = vpack.c.bf16 %v177_v10, %v176_v9  ;;  %v1681_v14 = vpack.c.bf16 %v179_v13, %v178_v11  ;;  %v80_v15 = vld [vmem:[#allocation4 + $0x8] sm:$0xff]  ;;  %v1138_v17 = vld [vmem:[%s1834_s3] ss:$0 sm:$0xff]  ;;  %s1562_s3 = smov 64  }
  0x4e   :  { %1316 = vmatpush3.bf16.msra.mxu0 %v1313_v5  ;;  %vm182_vm2 = vcmp.ge.s32.totalorder %v181_v21, 64  ;;  %vm183_vm3 = vcmp.lt.s32.totalorder %v181_v21, 96 }
  0x4f   :  { %1318 = vmatprep.subr.bf16.mxu0 %v1317_v8  ;;  %1323 = vmatpush3.bf16.msra.mxu1 %v1678_v12  ;;  %vm184_vm4 = vmand %vm182_vm2, %vm183_vm3 }
  0x50   :  { %1324 = vmatprep.subr.bf16.mxu1 %v1558_v0  ;;  %v1704_v26 = vsel %vm184_vm4, 1.0, %v1561_v25  ;;  %v1707_v31 = vsel %vm184_vm4, 0.0, %v1561_v25 }
  0x52   :  { %1320 = vmatpush3.bf16.msra.mxu0 %v1317_v8 }
  0x53   :  { %1326 = vmatpush3.bf16.msra.mxu1 %v1681_v14  ;;  %1327 = vmatprep.subr.bf16.mxu0 %v1558_v0 }
  0x54   :  { %1333 = vmatprep.subr.bf16.mxu1 %v1558_v0 }
  0x55   :  { %1212 = vmatmul.mubr.msk.f32.vlgmr.msra.gmra.mrb[0].mxu0 %vm92_vm1, %v80_v15 }
  0x56   :  { %1223 = vmatmul.mubr.f32.vlgmr.msra.gmra.mrb[0].mxu1 %v1560_v1  ;;  %1329 = vmatpush3.bf16.msra.mxu0 %v1678_v12 }
  0x57   :  { %1330 = vmatprep.subr.bf16.mxu0 %v1558_v0  ;;  %1233 = vmatprep.mubr.msk.f32.mxu0 %vm1559_vm0, %v1560_v1 }
  0x58   :  { %1335 = vmatpush3.bf16.msra.mxu1 %v1678_v12  ;;  %1244 = vmatprep.mubr.msk.f32.mxu1 %vm1559_vm0, %v1560_v1 }
  0x59   :  { %1336 = vmatprep.subr.bf16.mxu1 %v1558_v0 }
  0x5a   :  { %1332 = vmatpush3.bf16.msra.mxu0 %v1681_v14 }
  0x5b   :  { %1339 = vmatprep.subr.bf16.mxu0 %v1558_v0 }
  0x5c   :  { %1338 = vmatpush3.bf16.msra.mxu1 %v1681_v14 }
  0x5d   :  { %1345 = vmatprep.subr.bf16.mxu1 %v1558_v0 }
 0x128   :  { %v1213_v18 = vpop.f32.mrb[0].mxu0 }
 0x129   :  { %v171_v19 = vadd.f32 %v1213_v18, %v1138_v17  ;;  %v165_v20 = vpop.f32.mrb[1].mxu0  ;;  %v257_v22 = vpop.f32.mrb[0].mxu1 }
 0x12a   :  { %v166_v23 = vadd.f32 %v1138_v17, %v165_v20  ;;  %v1224_v24 = vpop.f32.mrb[1].mxu1 }
 0x12b   :  { %175 = vst [vmem:[#allocation2 + $0x8] sm:$0xff] %v171_v19 }
 0x12c   :  { %174 = vst [vmem:[#allocation2] sm:$0xff] %v166_v23 }
 0x133   :  { %v187_v27 = vld [vmem:[#allocation2] sm:$0x3]  ;;  %v289_v43 = vld [vmem:[#allocation2 + $0x2] sm:$0x3]  ;;  %v389_v60 = vld [vmem:[#allocation2 + $0x4] sm:$0x3] }
 0x134   :  { %v261_v28 = vadd.f32 %v257_v22, %v187_v27  ;;  %v489_v17 = vld [vmem:[#allocation2 + $0x6] sm:$0x3] }
 0x136   :  { %v262_v29 = vmul.f32 %v261_v28, %v1704_v26 }
 0x138   :  { %1390 = vtanh.f32 %v262_v29 }
 0x142   :  { %v1391_v30 = vpop.eup %1390 }
 0x143   :  { %v264_v32 = vmul.f32 %v1391_v30, %v1704_v26 }
 0x145   :  { %v265_v33 = vadd.f32 %v264_v32, %v1707_v31 }
 0x147   :  { %268 = vrot.lane.b32.xlu0 %v265_v33, %s1562_s3  ;;  %v266_v36 = vmul.f32 0.0, %v265_v33 }
 0x1b9   :  { %v269_v34 = vpop.permute.xlu0 %268 }
 0x1ba   :  { %v271_v35 = vmul.f32 %v269_v34, %v265_v33 }
 0x1bc   :  { %273 = vrot.lane.b32.xlu0 %v271_v35, %s1563_s22 }
 0x22e   :  { %v274_v37 = vpop.permute.xlu0 %273 }
 0x22f   :  { %v276_v38 = vadd.f32 %v274_v37, %v266_v36  ;;  %v589_v36 = vld [vmem:[#allocation2 + $0x8] sm:$0x3] }
 0x231   :  { %1392 = vtanh.f32 %v276_v38 }
 0x23b   :  { %v1393_v39 = vpop.eup %1392 }
 0x23c   :  { %279 = vrot.lane.b32.xlu1 %v1393_v39, %s1562_s3 }
 0x2ae   :  { %v280_v40 = vpop.permute.xlu1 %279 }
 0x2af   :  { %v282_v41 = vmul.f32 %v280_v40, %v265_v33 }
 0x2b1   :  { %284 = vrot.lane.b32.xlu1 %v282_v41, %s1563_s22 }
 0x323   :  { %v285_v42 = vpop.permute.xlu1 %284 }
 0x324   :  { %288 = vst.msk [vmem:[#allocation3] sm:$0x3] %vm287_vm5, %v285_v42  ;;  %1234 = vmatmul.mubr.msk.f32.vlgmr.msra.gmra.mrb[2].mxu0 %vm92_vm1, %v285_v42 }
 0x325   :  { %1341 = vmatpush3.bf16.msra.mxu0 %v1678_v12  ;;  %1255 = vmatprep.mubr.msk.f32.mxu0 %vm1559_vm0, %v1560_v1 }
 0x326   :  { %1342 = vmatprep.subr.bf16.mxu0 %v1558_v0 }
 0x329   :  { %1344 = vmatpush3.bf16.msra.mxu0 %v1681_v14 }
 0x32a   :  { %1351 = vmatprep.subr.bf16.mxu0 %v1558_v0 }
 0x3f7   :  { %v358_v44 = vpop.f32.mrb[2].mxu0 }
 0x3f8   :  { %v362_v45 = vadd.f32 %v358_v44, %v289_v43  ;;  %v1235_v46 = vpop.f32.mrb[3].mxu0 }
 0x3fa   :  { %v363_v47 = vmul.f32 %v362_v45, %v1704_v26 }
 0x3fc   :  { %1394 = vtanh.f32 %v363_v47 }
 0x406   :  { %v1395_v48 = vpop.eup %1394 }
 0x407   :  { %v365_v49 = vmul.f32 %v1395_v48, %v1704_v26 }
 0x409   :  { %v366_v50 = vadd.f32 %v365_v49, %v1707_v31 }
 0x40b   :  { %369 = vrot.lane.b32.xlu0 %v366_v50, %s1562_s3  ;;  %v367_v53 = vmul.f32 %v366_v50, %v276_v38 }
 0x47d   :  { %v370_v51 = vpop.permute.xlu0 %369 }
 0x47e   :  { %v372_v52 = vmul.f32 %v370_v51, %v366_v50 }
 0x480   :  { %374 = vrot.lane.b32.xlu1 %v372_v52, %s1563_s22 }
 0x4f2   :  { %v375_v54 = vpop.permute.xlu1 %374 }
 0x4f3   :  { %v377_v55 = vadd.f32 %v375_v54, %v367_v53  ;;  %v689_v53 = vld [vmem:[#allocation2 + $0xa] sm:$0x3] }
 0x4f5   :  { %1396 = vtanh.f32 %v377_v55 }
 0x4ff   :  { %v1397_v56 = vpop.eup %1396 }
 0x500   :  { %380 = vrot.lane.b32.xlu0 %v1397_v56, %s1562_s3 }
 0x572   :  { %v381_v57 = vpop.permute.xlu0 %380 }
 0x573   :  { %v383_v58 = vmul.f32 %v381_v57, %v366_v50 }
 0x575   :  { %385 = vrot.lane.b32.xlu1 %v383_v58, %s1563_s22 }
 0x5e7   :  { %v386_v59 = vpop.permute.xlu1 %385 }
 0x5e8   :  { %388 = vst.msk [vmem:[#allocation3 + $0x2] sm:$0x3] %vm287_vm5, %v386_v59  ;;  %1245 = vmatmul.mubr.msk.f32.vlgmr.msra.gmra.mrb[2].mxu1 %vm92_vm1, %v386_v59 }
 0x5e9   :  { %1347 = vmatpush3.bf16.msra.mxu1 %v1678_v12  ;;  %1266 = vmatprep.mubr.msk.f32.mxu1 %vm1559_vm0, %v1560_v1 }
 0x5ea   :  { %1348 = vmatprep.subr.bf16.mxu1 %v1558_v0 }
 0x5ed   :  { %1350 = vmatpush3.bf16.msra.mxu1 %v1681_v14 }
 0x5ee   :  { %1357 = vmatprep.subr.bf16.mxu1 %v1558_v0 }
 0x6bb   :  { %v458_v61 = vpop.f32.mrb[2].mxu1 }
 0x6bc   :  { %v462_v62 = vadd.f32 %v458_v61, %v389_v60  ;;  %v1246_v63 = vpop.f32.mrb[3].mxu1 }
 0x6be   :  { %v463_v2 = vmul.f32 %v462_v62, %v1704_v26 }
 0x6c0   :  { %1398 = vtanh.f32 %v463_v2 }
 0x6ca   :  { %v1399_v3 = vpop.eup %1398 }
 0x6cb   :  { %v465_v4 = vmul.f32 %v1399_v3, %v1704_v26 }
 0x6cd   :  { %v466_v5 = vadd.f32 %v465_v4, %v1707_v31 }
 0x6cf   :  { %469 = vrot.lane.b32.xlu0 %v466_v5, %s1562_s3  ;;  %v467_v8 = vmul.f32 %v466_v5, %v377_v55 }
 0x741   :  { %v470_v6 = vpop.permute.xlu0 %469 }
 0x742   :  { %v472_v7 = vmul.f32 %v470_v6, %v466_v5 }
 0x744   :  { %474 = vrot.lane.b32.xlu1 %v472_v7, %s1563_s22 }
 0x7b6   :  { %v475_v9 = vpop.permute.xlu1 %474 }
 0x7b7   :  { %v477_v10 = vadd.f32 %v475_v9, %v467_v8 }
 0x7b9   :  { %1400 = vtanh.f32 %v477_v10 }
 0x7c3   :  { %v1401_v11 = vpop.eup %1400 }
 0x7c4   :  { %480 = vrot.lane.b32.xlu0 %v1401_v11, %s1562_s3 }
 0x836   :  { %v481_v13 = vpop.permute.xlu0 %480 }
 0x837   :  { %v483_v15 = vmul.f32 %v481_v13, %v466_v5 }
 0x839   :  { %485 = vrot.lane.b32.xlu1 %v483_v15, %s1563_s22 }
 0x8ab   :  { %v486_v16 = vpop.permute.xlu1 %485 }
 0x8ac   :  { %488 = vst.msk [vmem:[#allocation3 + $0x4] sm:$0x3] %vm287_vm5, %v486_v16  ;;  %1256 = vmatmul.mubr.msk.f32.vlgmr.msra.gmra.mrb[4].mxu0 %vm92_vm1, %v486_v16 }
 0x8ad   :  { %1353 = vmatpush3.bf16.msra.mxu0 %v1678_v12  ;;  %1277 = vmatprep.mubr.msk.f32.mxu0 %vm1559_vm0, %v1560_v1 }
 0x8ae   :  { %1354 = vmatprep.subr.bf16.mxu0 %v1558_v0 }
 0x8b1   :  { %1356 = vmatpush3.bf16.msra.mxu0 %v1681_v14 }
 0x8b2   :  { %1363 = vmatprep.subr.bf16.mxu0 %v1558_v0 }
 0x97f   :  { %v558_v18 = vpop.f32.mrb[4].mxu0 }
 0x980   :  { %v562_v19 = vadd.f32 %v558_v18, %v489_v17  ;;  %v1257_v20 = vpop.f32.mrb[5].mxu0 }
 0x982   :  { %v563_v21 = vmul.f32 %v562_v19, %v1704_v26 }
 0x984   :  { %1402 = vtanh.f32 %v563_v21 }
 0x98e   :  { %v1403_v22 = vpop.eup %1402 }
 0x98f   :  { %v565_v23 = vmul.f32 %v1403_v22, %v1704_v26 }
 0x991   :  { %v566_v24 = vadd.f32 %v565_v23, %v1707_v31 }
 0x993   :  { %569 = vrot.lane.b32.xlu0 %v566_v24, %s1562_s3  ;;  %v567_v28 = vmul.f32 %v566_v24, %v477_v10  ;;  %v789_v10 = vld [vmem:[#allocation2 + $0xc] sm:$0x3] }
 0xa05   :  { %v570_v25 = vpop.permute.xlu0 %569 }
 0xa06   :  { %v572_v27 = vmul.f32 %v570_v25, %v566_v24 }
 0xa08   :  { %574 = vrot.lane.b32.xlu1 %v572_v27, %s1563_s22 }
 0xa7a   :  { %v575_v29 = vpop.permute.xlu1 %574 }
 0xa7b   :  { %v577_v30 = vadd.f32 %v575_v29, %v567_v28 }
 0xa7d   :  { %1404 = vtanh.f32 %v577_v30 }
 0xa87   :  { %v1405_v32 = vpop.eup %1404 }
 0xa88   :  { %580 = vrot.lane.b32.xlu0 %v1405_v32, %s1562_s3 }
 0xafa   :  { %v581_v33 = vpop.permute.xlu0 %580 }
 0xafb   :  { %v583_v34 = vmul.f32 %v581_v33, %v566_v24 }
 0xafd   :  { %585 = vrot.lane.b32.xlu1 %v583_v34, %s1563_s22 }
 0xb6f   :  { %v586_v35 = vpop.permute.xlu1 %585 }
 0xb70   :  { %588 = vst.msk [vmem:[#allocation3 + $0x6] sm:$0x3] %vm287_vm5, %v586_v35  ;;  %1267 = vmatmul.mubr.msk.f32.vlgmr.msra.gmra.mrb[4].mxu1 %vm92_vm1, %v586_v35 }
 0xb71   :  { %1359 = vmatpush3.bf16.msra.mxu1 %v1678_v12  ;;  %1288 = vmatprep.mubr.msk.f32.mxu1 %vm1559_vm0, %v1560_v1 }
 0xb72   :  { %1360 = vmatprep.subr.bf16.mxu1 %v1558_v0 }
 0xb75   :  { %1362 = vmatpush3.bf16.msra.mxu1 %v1681_v14 }
 0xb77   :  { %v989_v3 = vld [vmem:[#allocation3] sm:$0xff] }
 0xb78   :  { %v993_v4 = vmul.f32 0.70710677, %v989_v3  ;;  %v991_v7 = vmul.f32 0.5, %v989_v3 }
 0xc43   :  { %v658_v37 = vpop.f32.mrb[4].mxu1 }
 0xc44   :  { %v662_v38 = vadd.f32 %v658_v37, %v589_v36  ;;  %v1268_v39 = vpop.f32.mrb[5].mxu1 }
 0xc46   :  { %v663_v40 = vmul.f32 %v662_v38, %v1704_v26 }
 0xc48   :  { %1406 = vtanh.f32 %v663_v40 }
 0xc52   :  { %v1407_v41 = vpop.eup %1406 }
 0xc53   :  { %v665_v42 = vmul.f32 %v1407_v41, %v1704_v26 }
 0xc55   :  { %v666_v43 = vadd.f32 %v665_v42, %v1707_v31 }
 0xc57   :  { %669 = vrot.lane.b32.xlu0 %v666_v43, %s1562_s3  ;;  %v667_v46 = vmul.f32 %v666_v43, %v577_v30  ;;  %v889_v30 = vld [vmem:[#allocation2 + $0xe] sm:$0x3] }
 0xcc9   :  { %v670_v44 = vpop.permute.xlu0 %669 }
 0xcca   :  { %v672_v45 = vmul.f32 %v670_v44, %v666_v43 }
 0xccc   :  { %674 = vrot.lane.b32.xlu1 %v672_v45, %s1563_s22  ;;  %v1001_v45 = vld [vmem:[#allocation10] sm:$0xff] }
 0xd3e   :  { %v675_v47 = vpop.permute.xlu1 %674 }
 0xd3f   :  { %v677_v48 = vadd.f32 %v675_v47, %v667_v46  ;;  %v1002_v46 = vld [vmem:[#allocation10 + $0x8] sm:$0xff]  ;;  %v1003_v47 = vld [vmem:[#allocation10 + $0x10] sm:$0xff] }
 0xd41   :  { %1408 = vtanh.f32 %v677_v48 }
 0xd4b   :  { %v1409_v49 = vpop.eup %1408 }
 0xd4c   :  { %680 = vrot.lane.b32.xlu0 %v1409_v49, %s1562_s3 }
 0xdbe   :  { %v681_v50 = vpop.permute.xlu0 %680 }
 0xdbf   :  { %v683_v51 = vmul.f32 %v681_v50, %v666_v43 }
 0xdc1   :  { %685 = vrot.lane.b32.xlu1 %v683_v51, %s1563_s22 }
 0xe33   :  { %v686_v52 = vpop.permute.xlu1 %685 }
 0xe34   :  { %688 = vst.msk [vmem:[#allocation3 + $0x8] sm:$0x3] %vm287_vm5, %v686_v52  ;;  %1278 = vmatmul.mubr.msk.f32.vlgmr.msra.gmra.mrb[6].mxu0 %vm92_vm1, %v686_v52 }
 0xe35   :  { %1365 = vmatpush3.bf16.msra.mxu0 %v1678_v12  ;;  %1299 = vmatprep.mubr.msk.f32.mxu0 %vm1559_vm0, %v1560_v1 }
 0xe36   :  { %1366 = vmatprep.subr.bf16.mxu0 %v1558_v0 }
 0xe39   :  { %1368 = vmatpush3.bf16.msra.mxu0 %v1681_v14 }
 0xf07   :  { %v758_v54 = vpop.f32.mrb[6].mxu0 }
 0xf08   :  { %v762_v55 = vadd.f32 %v758_v54, %v689_v53  ;;  %v1279_v56 = vpop.f32.mrb[7].mxu0 }
 0xf0a   :  { %v763_v57 = vmul.f32 %v762_v55, %v1704_v26 }
 0xf0c   :  { %1410 = vtanh.f32 %v763_v57 }
 0xf16   :  { %v1411_v58 = vpop.eup %1410 }
 0xf17   :  { %v765_v59 = vmul.f32 %v1411_v58, %v1704_v26  ;;  %v1148_v58 = vld [vmem:[%s1836_s5] ss:$0 sm:$0xff]  ;;  %s1564_s5 = smov [#allocation12]  }
 0xf18   :  { %s1124_s26 = sshll.u32 %s1564_s5, 4  ;;  %s1125_s26 = int_to_ptr.vmem [resolvable:$true] %s1124_s26 }
 0xf19   :  { %v766_v60 = vadd.f32 %v765_v59, %v1707_v31  ;;  %s1522_s27 = scalar_lea.vmem %s1125_s26, 256  ;;  %p1527_p5 = scmp.lt.s32.totalorder %s1125_s26, %s1125_s26 }
 0xf1a   :  { %p1523_p4 = scmp.ne.s32.totalorder %s1125_s26, %s1522_s27  ;;  %p1528_p6 = scmp.lt.s32.totalorder %s1522_s27, %s1522_s27 }
 0xf1b   :  { %769 = vrot.lane.b32.xlu0 %v766_v60, %s1562_s3  ;;  %v767_v0 = vmul.f32 %v766_v60, %v677_v48  ;;  %v1369_v48 = vpack.c.bf16 %v1002_v46, %v1001_v45 }
 0xf1c   :  { %p1529_p7 = por %p1528_p6, %p1527_p5 }
 0xf1d   :  { %1370 = vmatprep.subr.bf16.mxu1 %v1369_v48 }
 0xf1e   :  { %p1530_p8 = pnand %p1529_p7, %p1523_p4 }
 0xf8d   :  { %v770_v12 = vpop.permute.xlu0 %769 }
 0xf8e   :  { %v772_v1 = vmul.f32 %v770_v12, %v766_v60 }
 0xf90   :  { %774 = vrot.lane.b32.xlu1 %v772_v1, %s1563_s22 }
0x1002   :  { %v775_v14 = vpop.permute.xlu1 %774 }
0x1003   :  { %v777_v61 = vadd.f32 %v775_v14, %v767_v0 }
0x1005   :  { %1412 = vtanh.f32 %v777_v61 }
0x1006   :  { %1414 = verf.f32 %v993_v4 }
0x100f   :  { %v1413_v62 = vpop.eup %1412 }
0x1010   :  { %780 = vrot.lane.b32.xlu0 %v1413_v62, %s1562_s3  ;;  %v1415_v5 = vpop.eup %1414 }
0x1011   :  { %v997_v6 = vadd.f32 1.0, %v1415_v5 }
0x1013   :  { %v999_v9 = vmul.f32 %v997_v6, %v991_v7 }
0x1082   :  { %v781_v63 = vpop.permute.xlu0 %780 }
0x1083   :  { %v783_v2 = vmul.f32 %v781_v63, %v766_v60 }
0x1085   :  { %785 = vrot.lane.b32.xlu1 %v783_v2, %s1563_s22 }
0x10f7   :  { %v786_v8 = vpop.permute.xlu1 %785 }
0x10f8   :  { %788 = vst.msk [vmem:[#allocation3 + $0xa] sm:$0x3] %vm287_vm5, %v786_v8  ;;  %1289 = vmatmul.mubr.msk.f32.vlgmr.msra.gmra.mrb[6].mxu1 %vm92_vm1, %v786_v8 }
0x10f9   :  { %1310 = vmatprep.mubr.msk.f32.mxu1 %vm92_vm1, %v999_v9  ;;  %1372 = vmatpush3.bf16.msra.mxu1 %v1369_v48 }
0x11cb   :  { %v858_v11 = vpop.f32.mrb[6].mxu1 }
0x11cc   :  { %v862_v13 = vadd.f32 %v858_v11, %v789_v10  ;;  %v1290_v15 = vpop.f32.mrb[7].mxu1 }
0x11ce   :  { %v863_v16 = vmul.f32 %v862_v13, %v1704_v26 }
0x11d0   :  { %1416 = vtanh.f32 %v863_v16 }
0x11da   :  { %v1417_v17 = vpop.eup %1416 }
0x11db   :  { %v865_v18 = vmul.f32 %v1417_v17, %v1704_v26 }
0x11dd   :  { %v866_v19 = vadd.f32 %v865_v18, %v1707_v31 }
0x11df   :  { %869 = vrot.lane.b32.xlu0 %v866_v19, %s1562_s3  ;;  %v867_v22 = vmul.f32 %v866_v19, %v777_v61 }
0x1251   :  { %v870_v20 = vpop.permute.xlu0 %869 }
0x1252   :  { %v872_v21 = vmul.f32 %v870_v20, %v866_v19 }
0x1254   :  { %874 = vrot.lane.b32.xlu1 %v872_v21, %s1563_s22 }
0x12c6   :  { %v875_v23 = vpop.permute.xlu1 %874 }
0x12c7   :  { %v877_v24 = vadd.f32 %v875_v23, %v867_v22 }
0x12c9   :  { %1418 = vtanh.f32 %v877_v24 }
0x12d3   :  { %v1419_v25 = vpop.eup %1418 }
0x12d4   :  { %880 = vrot.lane.b32.xlu0 %v1419_v25, %s1562_s3 }
0x1346   :  { %v881_v27 = vpop.permute.xlu0 %880 }
0x1347   :  { %v883_v28 = vmul.f32 %v881_v27, %v866_v19 }
0x1349   :  { %885 = vrot.lane.b32.xlu1 %v883_v28, %s1563_s22 }
0x13bb   :  { %v886_v29 = vpop.permute.xlu1 %885 }
0x13bc   :  { %888 = vst.msk [vmem:[#allocation3 + $0xc] sm:$0x3] %vm287_vm5, %v886_v29  ;;  %1300 = vmatmul.mubr.msk.f32.vlgmr.msra.gmra.mrb[8].mxu0 %vm92_vm1, %v886_v29 }
0x148f   :  { %v958_v32 = vpop.f32.mrb[8].mxu0 }
0x1490   :  { %v962_v33 = vadd.f32 %v958_v32, %v889_v30  ;;  %v1301_v34 = vpop.f32.mrb[9].mxu0 }
0x1492   :  { %v963_v35 = vmul.f32 %v962_v33, %v1704_v26 }
0x1494   :  { %1420 = vtanh.f32 %v963_v35 }
0x149e   :  { %v1421_v36 = vpop.eup %1420 }
0x149f   :  { %v965_v37 = vmul.f32 %v1421_v36, %v1704_v26  ;;  %v1004_v26 = vld [vmem:[#allocation10 + $0x18] sm:$0xff] }
0x14a0   :  { %v1373_v49 = vpack.c.bf16 %v1004_v26, %v1003_v47 }
0x14a1   :  { %v966_v38 = vadd.f32 %v965_v37, %v1707_v31 }
0x14a2   :  { %1374 = vmatprep.subr.bf16.mxu1 %v1373_v49 }
0x14a3   :  { %969 = vrot.lane.b32.xlu0 %v966_v38, %s1562_s3  ;;  %v967_v41 = vmul.f32 %v966_v38, %v877_v24  ;;  %1376 = vmatpush3.bf16.msra.mxu1 %v1373_v49 }
0x1515   :  { %v970_v39 = vpop.permute.xlu0 %969 }
0x1516   :  { %v972_v40 = vmul.f32 %v970_v39, %v966_v38 }
0x1518   :  { %974 = vrot.lane.b32.xlu1 %v972_v40, %s1563_s22 }
0x158a   :  { %v975_v42 = vpop.permute.xlu1 %974 }
0x158b   :  { %v977_v43 = vadd.f32 %v975_v42, %v967_v41 }
0x158d   :  { %1422 = vtanh.f32 %v977_v43 }
0x1597   :  { %v1423_v44 = vpop.eup %1422 }
0x1598   :  { %980 = vrot.lane.b32.xlu0 %v1423_v44, %s1562_s3 }
0x160a   :  { %v981_v31 = vpop.permute.xlu0 %980 }
0x160b   :  { %v983_v50 = vmul.f32 %v981_v31, %v966_v38 }
0x160d   :  { %985 = vrot.lane.b32.xlu1 %v983_v50, %s1563_s22 }
0x167f   :  { %v986_v51 = vpop.permute.xlu1 %985 }
0x1680   :  { %988 = vst.msk [vmem:[#allocation3 + $0xe] sm:$0x3] %vm287_vm5, %v986_v51 }
0x1687   :  { %v990_v52 = vld [vmem:[#allocation3 + $0x8] sm:$0xff] }
0x1688   :  { %v994_v53 = vmul.f32 0.70710677, %v990_v52  ;;  %v992_v55 = vmul.f32 0.5, %v990_v52 }
0x168a   :  { %1424 = verf.f32 %v994_v53 }
0x1694   :  { %v1425_v54 = vpop.eup %1424 }
0x1695   :  { %v998_v56 = vadd.f32 1.0, %v1425_v54 }
0x1697   :  { %v1000_v57 = vmul.f32 %v998_v56, %v992_v55 }
0x1699   :  { %1311 = vmatmul.mubr.msk.f32.vlgmr.msra.gmra.mrb[8].mxu1 %vm92_vm1, %v1000_v57 }
0x176c   :  { %v1312_v59 = vpop.f32.mrb[8].mxu1 }
0x176d   :  { %v1090_v60 = vadd.f32 %v1312_v59, %v1148_v58  ;;  %v1084_v12 = vpop.f32.mrb[9].mxu1 }
0x176e   :  { %v1085_v1 = vadd.f32 %v1148_v58, %v1084_v12 }
0x176f   :  { %v1096_v0 = vmul.f32 0.70710677, %v1090_v60  ;;  %v1094_v63 = vmul.f32 0.5, %v1090_v60 }
0x1770   :  { %v1095_v14 = vmul.f32 0.70710677, %v1085_v1  ;;  %v1093_v3 = vmul.f32 0.5, %v1085_v1 }
0x1771   :  { %1426 = verf.f32 %v1096_v0 }
0x1772   :  { %1428 = verf.f32 %v1095_v14 }
0x177b   :  { %v1427_v61 = vpop.eup %1426 }
0x177c   :  { %v1429_v62 = vpop.eup %1428  ;;  %v1100_v2 = vadd.f32 1.0, %v1427_v61 }
0x177d   :  { %v1099_v4 = vadd.f32 1.0, %v1429_v62 }
0x177e   :  { %v1102_v5 = vmul.f32 %v1100_v2, %v1094_v63 }
0x177f   :  { %v1101_v6 = vmul.f32 %v1099_v4, %v1093_v3 }
0x1780   :  { %v1104_v7 = vmul.f32 %v1102_v5, %v1102_v5 }
0x1781   :  { %v1103_v8 = vmul.f32 %v1101_v6, %v1101_v6 }
0x1782   :  { %v1108_v9 = vsel %vm92_vm1, %v1104_v7, 0.0 }
0x1783   :  { %1109 = vadd.xlane.f32.xlu1 %v1108_v9  ;;  %v1105_v10 = vsel %vm92_vm1, %v1103_v8, 0.0 }
0x1784   :  { %1106 = vadd.xlane.f32.xlu0 %v1105_v10 }
0x1810   :  { %v1110_v11 = vpop.xlane.xlu1 %1109 }
0x1811   :  { %v1112_v13 = vmax.f32 %v1110_v11, 1e-24  ;;  %v1107_v15 = vpop.xlane.xlu0 %1106 }
0x1812   :  { %v1111_v16 = vmax.f32 %v1107_v15, 1e-24 }
0x1813   :  { %1430 = vrsqrt.f32 %v1112_v13 }
0x1814   :  { %1432 = vrsqrt.f32 %v1111_v16 }
0x181d   :  { %v1431_v17 = vpop.eup %1430 }
0x181e   :  { %v1433_v18 = vpop.eup %1432  ;;  %v1116_v19 = vmul.f32 %v1431_v17, %v1102_v5 }
0x181f   :  { %v1115_v20 = vmul.f32 %v1433_v18, %v1101_v6 }
0x1820   :  { %1118 = vst.msk [vmem:[#allocation12 + $0x8] sm:$0xff] %vm92_vm1, %v1116_v19 }
0x1821   :  { %1117 = vst.msk [vmem:[#allocation12] sm:$0xff] %vm92_vm1, %v1115_v20 }
0x1822   :  { %1533 = shalt.err (!%p1530_p8)
}
0x1823   :  { %s1534_s30 = scalar_lea.hbm %s1837_s6, 256 }
0x1824   :  { %p1535_p9 = scmp.ne.s32.totalorder %s1837_s6, %s1534_s30  ;;  %p1538_p10 = scmp.lt.u32.totalorder %s1534_s30, %s1837_s6 }
0x1826   :  { %p1540_p11 = pnand %p1538_p10, %p1535_p9 }
0x1828   :  { %1543 = shalt.err (!%p1540_p11)
}
0x1829   :  { %1130 = dma.vmem_to_hbm [thread:$0]  %s1125_s26, 256, %s1837_s6, [#allocation6], %s1554_s9, %s1554_s9, %s1555_s10  }
0x182a   :  { %1550 = dma.done.wait [#allocation6], 256  }
0x182b   :  { %1551 = vsyncadd [#allocation6], 4294967040 }
0x182c   :  { %1134 = vsyncpa [#allocation5], 1 }
0x182d   :  { %1135 = vsyncpa [#allocation8], 1 }
0x182e   :  { %1136 = vsyncpa [#allocation11], 1 }
0x182f   :  { %1137 = vsyncpa [#allocation6], 1 }

</bundles_post_ra>
